<compile_context>
chip_gen: v5e
topology: v5e:2x2
jax: 0.10.0
libtpu: 0.0.40
codegen_flags: <defaults>
</compile_context>

<pallas_src>
import functools

import jax
import jax.numpy as jnp
from jax.experimental import pallas as pl
from jax.experimental.pallas import tpu as pltpu

LANE = 128      # TPU lane width: hidden / output feature dims are padded to this
BIAS_ROWS = 8   # one f32 sublane tile holding b1 (row 0) and b2 (row 1)


def _simple_nn_kernel(x_ref, params_ref, o_ref, *, d_in):
    """fc1 -> sigmoid -> fc2 -> custom_softmax(axis=0), everything resident in VMEM.

    params_ref row layout (all rows lane-padded to LANE columns):
      [0, d_in)                     : w1^T            (d_in, LANE), cols >= H are zero
      [d_in, d_in+BIAS_ROWS)        : row 0 = b1, row 1 = b2, remaining rows zero
      [d_in+BIAS_ROWS, +LANE)       : w2^T padded to (LANE, LANE); rows >= H and
                                      cols >= D_out are zero
    """
    x = x_ref[...]                                                   # (B, d_in)

    w1 = params_ref[0:d_in, :]                                       # (d_in, LANE)
    biases = params_ref[d_in:d_in + BIAS_ROWS, :]                    # (8, LANE)
    b1 = biases[0:1, :]                                              # (1, LANE)
    b2 = biases[1:2, :]                                              # (1, LANE)
    w2 = params_ref[d_in + BIAS_ROWS:d_in + BIAS_ROWS + LANE, :]     # (LANE, LANE)

    # fc1 + sigmoid (single EUP tanh per element; padded hidden cols -> sigmoid(0)=0.5)
    h_lin = jnp.dot(x, w1, preferred_element_type=jnp.float32) + b1
    h = 0.5 * (jnp.tanh(0.5 * h_lin) + 1.0)

    # fc2: zero rows of w2 kill the padded-hidden 0.5s; zero cols stay zero.
    y = jnp.dot(h, w2, preferred_element_type=jnp.float32) + b2

    # custom_softmax: exp(y) / exp(y).sum(axis=0) -- reduction over the BATCH axis.
    # fc2 outputs are bounded, so the unshifted form matches the PyTorch reference.
    e = jnp.exp(y)
    denom = jnp.sum(e, axis=0, keepdims=True)                        # (1, LANE)
    o_ref[...] = (e / denom).astype(o_ref.dtype)                     # lane-dense store


def pack_params(w1, b1, w2, b2):
    """One-time pre-bake of PyTorch-layout params into a single lane-padded VMEM slab."""
    w1 = jnp.asarray(w1, jnp.float32)    # (H, D_in)
    b1 = jnp.asarray(b1, jnp.float32)    # (H,)
    w2 = jnp.asarray(w2, jnp.float32)    # (D_out, H)
    b2 = jnp.asarray(b2, jnp.float32)    # (D_out,)

    h, d_in = w1.shape
    d_out = w2.shape[0]
    assert h <= LANE and d_out <= LANE
    assert d_in % 8 == 0, "keep w1^T segment sublane-tile aligned"

    w1_t = jnp.zeros((d_in, LANE), jnp.float32).at[:, :h].set(w1.T)
    bias_blk = (jnp.zeros((BIAS_ROWS, LANE), jnp.float32)
                .at[0, :h].set(b1)
                .at[1, :d_out].set(b2))
    w2_full = jnp.zeros((LANE, LANE), jnp.float32).at[:h, :d_out].set(w2.T)

    params = jnp.concatenate([w1_t, bias_blk, w2_full], axis=0)      # (d_in+8+128, 128)
    return params, d_in, d_out


def make_simple_nn_forward(w1, b1, w2, b2):
    """Returns a jitted forward(x) closure with all layout work pre-baked."""
    params, d_in, d_out = pack_params(w1, b1, w2, b2)

    vmem = pl.BlockSpec(memory_space=pltpu.MemorySpace.VMEM)
    kernel = functools.partial(_simple_nn_kernel, d_in=d_in)

    def _forward(x):
        b = x.shape[0]
        out_padded = pl.pallas_call(
            kernel,
            out_shape=jax.ShapeDtypeStruct((b, LANE), jnp.float32),
            in_specs=[vmem, vmem],       # 2 input DMAs: x + packed params
            out_specs=vmem,
        )(x.astype(jnp.float32), params)
        # Padded softmax columns (finite 1/B values) are sliced away here; the slice
        # lives inside the same jit as the pallas_call, so it is fused (no extra dispatch).
        return out_padded[:, :d_out]

    return jax.jit(_forward)


def init_linear_params(key, out_features, in_features):
    # Mirror PyTorch nn.Linear default init: U(-1/sqrt(fan_in), +1/sqrt(fan_in))
    kw, kb = jax.random.split(key)
    bound = 1.0 / jnp.sqrt(jnp.float32(in_features))
    w = jax.random.uniform(kw, (out_features, in_features), jnp.float32, -bound, bound)
    b = jax.random.uniform(kb, (out_features,), jnp.float32, -bound, bound)
    return w, b


if __name__ == "__main__":
    # Small shapes consistent with the module: batch=8, input=32, hidden=32, output=16.
    B, D_in, H, D_out = 8, 32, 32, 16

    key = jax.random.PRNGKey(0)
    kx, k1, k2 = jax.random.split(key, 3)

    x = jax.random.normal(kx, (B, D_in), dtype=jnp.float32)
    w1, b1 = init_linear_params(k1, H, D_in)
    w2, b2 = init_linear_params(k2, D_out, H)

    forward = make_simple_nn_forward(w1, b1, w2, b2)
    out = jax.block_until_ready(forward(x))

    # Pure-JAX reference (highest-precision matmuls so the comparison is not limited
    # by XLA's default reduced-precision f32 matmul passes).
    hp = jax.lax.Precision.HIGHEST
    h_ref = jax.nn.sigmoid(jnp.dot(x, w1.T, precision=hp) + b1)
    y_ref = jnp.dot(h_ref, w2.T, precision=hp) + b2
    e_ref = jnp.exp(y_ref)
    ref = e_ref / e_ref.sum(axis=0)

    assert out.shape == (B, D_out)
    max_err = float(jnp.max(jnp.abs(out - ref)))
    assert jnp.allclose(out, ref, atol=1e-4, rtol=1e-3), max_err

    print("KERNEL_OK")
</pallas_src>

<mosaic_0001>
module attributes {stable_mosaic.version = 11 : i64} {
  func.func @_simple_nn_kernel(%arg0: memref<8x32xf32, #tpu.memory_space<vmem>>, %arg1: memref<168x128xf32, #tpu.memory_space<vmem>>, %arg2: memref<8x128xf32, #tpu.memory_space<vmem>>) attributes {dimension_semantics = [], scalar_prefetch = 0 : i64, scratch_operands = 0 : i64, tpu.core_type = #tpu.core_type<tc>} {
    %c0 = arith.constant 0 : index
    %c0_0 = arith.constant 0 : index
    %0 = vector.load %arg0[%c0, %c0_0] : memref<8x32xf32, #tpu.memory_space<vmem>>, vector<8x32xf32>
    %c0_1 = arith.constant 0 : index
    %c0_2 = arith.constant 0 : index
    %1 = vector.load %arg1[%c0_1, %c0_2] : memref<168x128xf32, #tpu.memory_space<vmem>>, vector<32x128xf32>
    %c32 = arith.constant 32 : index
    %c0_3 = arith.constant 0 : index
    %2 = vector.load %arg1[%c32, %c0_3] : memref<168x128xf32, #tpu.memory_space<vmem>>, vector<8x128xf32>
    %3 = vector.extract_strided_slice %2 {offsets = [0, 0], sizes = [1, 128], strides = [1, 1]} : vector<8x128xf32> to vector<1x128xf32>
    %4 = vector.extract_strided_slice %2 {offsets = [1, 0], sizes = [1, 128], strides = [1, 1]} : vector<8x128xf32> to vector<1x128xf32>
    %c40 = arith.constant 40 : index
    %c0_4 = arith.constant 0 : index
    %5 = vector.load %arg1[%c40, %c0_4] : memref<168x128xf32, #tpu.memory_space<vmem>>, vector<128x128xf32>
    %cst = arith.constant dense<0.000000e+00> : vector<8x128xf32>
    %6 = tpu.matmul %0, %1, %cst {dimension_numbers = #tpu.dot_dimension_numbers<[1], [0], [0], [1], [0, 0, 1, 1], [], []>} : vector<8x32xf32>, vector<32x128xf32>, vector<8x128xf32> -> vector<8x128xf32>
    %7 = vector.broadcast %3 : vector<1x128xf32> to vector<8x128xf32>
    %8 = arith.addf %6, %7 : vector<8x128xf32>
    %cst_5 = arith.constant 5.000000e-01 : f32
    %9 = vector.broadcast %cst_5 : f32 to vector<8x128xf32>
    %10 = arith.mulf %9, %8 : vector<8x128xf32>
    %11 = math.tanh %10 : vector<8x128xf32>
    %cst_6 = arith.constant 1.000000e+00 : f32
    %12 = vector.broadcast %cst_6 : f32 to vector<8x128xf32>
    %13 = arith.addf %11, %12 : vector<8x128xf32>
    %cst_7 = arith.constant 5.000000e-01 : f32
    %14 = vector.broadcast %cst_7 : f32 to vector<8x128xf32>
    %15 = arith.mulf %14, %13 : vector<8x128xf32>
    %cst_8 = arith.constant dense<0.000000e+00> : vector<8x128xf32>
    %16 = tpu.matmul %15, %5, %cst_8 {dimension_numbers = #tpu.dot_dimension_numbers<[1], [0], [0], [1], [0, 0, 1, 1], [], []>} : vector<8x128xf32>, vector<128x128xf32>, vector<8x128xf32> -> vector<8x128xf32>
    %17 = vector.broadcast %4 : vector<1x128xf32> to vector<8x128xf32>
    %18 = arith.addf %16, %17 : vector<8x128xf32>
    %19 = math.exp %18 : vector<8x128xf32>
    %cst_9 = arith.constant dense<0.000000e+00> : vector<128xf32>
    %20 = vector.multi_reduction <add>, %19, %cst_9 [0] : vector<8x128xf32> to vector<128xf32>
    %21 = vector.shape_cast %20 : vector<128xf32> to vector<1x128xf32>
    %22 = vector.broadcast %21 : vector<1x128xf32> to vector<8x128xf32>
    %23 = arith.divf %19, %22 : vector<8x128xf32>
    %c0_10 = arith.constant 0 : index
    %c0_11 = arith.constant 0 : index
    %24 = vector.load %arg2[%c0_10, %c0_11] : memref<8x128xf32, #tpu.memory_space<vmem>>, vector<8x128xf32>
    tpu.vector_store %arg2[%c0_10, %c0_11], %23 {strides = array<i32>} : memref<8x128xf32, #tpu.memory_space<vmem>>, vector<8x128xf32>,
    return
  }
}

</mosaic_0001>

<bundles_post_ra>
// kernel: _forward.1
= control target key start
LH: loop header
LB: loop body
LE: loop exit
PB: predicated region body
PF: predicated region fallthrough
CT: control target
= control target key end

     0   :  { %7 = vsyncpa [#allocation3], 0  ;;  %s275_s0 = inlined_call_operand.hbm [shape: f32[8,32], index: 0, kind: input, shape index: {}]   ;;  %s276_s1 = inlined_call_operand.hbm [shape: f32[168,128], index: 1, kind: input, shape index: {}]   ;;  %s277_s2 = inlined_call_operand.hbm [shape: f32[8,128], index: 2, kind: output, shape index: {}]  }
   0x1   :  { %8 = vsyncpa [#allocation6], 0 }
   0x2   :  { %9 = vsyncpa [#allocation4], 0  ;;  %s15_s11 = sshll.u32 %s275_s0, 4  ;;  %s246_s12 = smov [#allocation2]   ;;  %s16_s11 = int_to_ptr.hbm [resolvable:$true] %s15_s11 }
   0x3   :  { %s17_s13 = sshll.u32 %s246_s12, 4  ;;  %s25_s16 = sshll.u32 %s276_s1, 4  ;;  %s18_s13 = int_to_ptr.vmem [resolvable:$true] %s17_s13  ;;  %s26_s16 = int_to_ptr.hbm [resolvable:$true] %s25_s16 }
   0x4   :  { %20 = dma.hbm_to_vmem [thread:$0]  %s16_s11, 128, %s18_s13, [#allocation3]  }
   0x5   :  { %s247_s17 = smov [#allocation5]   ;;  %s248_s19 = smov 128  }
   0x6   :  { %s27_s18 = sshll.u32 %s247_s17, 4  ;;  %s249_s20 = smov 8   ;;  %s28_s18 = int_to_ptr.vmem [resolvable:$true] %s27_s18 }
   0x7   :  { %33 = dma.hbm_to_vmem [thread:$0]  %s26_s16, 2688, %s28_s18, [#allocation6], %s248_s19, %s248_s19, %s249_s20  }
   0x8   :  { %240 = dma.done.wait [#allocation3], 128  }
   0x9   :  { %241 = vsyncadd [#allocation3], 4294967168 }
   0xa   :  { %242 = dma.done.wait [#allocation6], 2688  }
   0xb   :  { %243 = vsyncadd [#allocation6], 4294964608  ;;  %v46_v0 = vld [vmem:[#allocation5 + $0x18] sm:$0xff]  ;;  %v45_v1 = vld [vmem:[#allocation5 + $0x10] sm:$0xff]  ;;  %vm65_vm0 = vcmask 261120   ;;  %s250_s0 = smov [#allocation7]  }
   0xc   :  { %81 = vmatpush.msra.mxu0 %v46_v0  ;;  %v63_v2 = vld [vmem:[#allocation5 + $0xa0] sm:$0xff]  ;;  %v44_v3 = vld [vmem:[#allocation5 + $0x8] sm:$0xff]  ;;  %v62_v4 = vld [vmem:[#allocation5 + $0x98] sm:$0xff]  ;;  %s143_s1 = sshll.u32 %s250_s0, 4  ;;  %s145_s23 = sshll.u32 %s277_s2, 4  ;;  %s144_s1 = int_to_ptr.vmem [resolvable:$true] %s143_s1  ;;  %s146_s23 = int_to_ptr.hbm [resolvable:$true] %s145_s23 }
   0xd   :  { %94 = vmatpush.msra.mxu1 %v63_v2  ;;  %v61_v5 = vld [vmem:[#allocation5 + $0x90] sm:$0xff]  ;;  %v43_v6 = vld [vmem:[#allocation5] sm:$0xff]  ;;  %v42_v7 = vld [vmem:[#allocation2] sm:$0xff] }
   0xe   :  { %82 = vmatpush.msra.mxu0 %v45_v1  ;;  %v60_v8 = vld [vmem:[#allocation5 + $0x88] sm:$0xff]  ;;  %v59_v9 = vld [vmem:[#allocation5 + $0x80] sm:$0xff]  ;;  %v58_v10 = vld [vmem:[#allocation5 + $0x78] sm:$0xff] }
   0xf   :  { %95 = vmatpush.msra.mxu1 %v62_v4  ;;  %v57_v11 = vld [vmem:[#allocation5 + $0x70] sm:$0xff]  ;;  %v56_v12 = vld [vmem:[#allocation5 + $0x68] sm:$0xff]  ;;  %v55_v13 = vld [vmem:[#allocation5 + $0x60] sm:$0xff] }
  0x10   :  { %83 = vmatpush.msra.mxu0 %v44_v3  ;;  %v54_v14 = vld [vmem:[#allocation5 + $0x58] sm:$0xff]  ;;  %v53_v15 = vld [vmem:[#allocation5 + $0x50] sm:$0xff]  ;;  %v52_v16 = vld [vmem:[#allocation5 + $0x48] sm:$0xff] }
  0x11   :  { %96 = vmatpush.msra.mxu1 %v61_v5  ;;  %v51_v17 = vld [vmem:[#allocation5 + $0x40] sm:$0xff]  ;;  %v50_v18 = vld [vmem:[#allocation5 + $0x38] sm:$0xff]  ;;  %v49_v19 = vld [vmem:[#allocation5 + $0x30] sm:$0xff] }
  0x12   :  { %84 = vmatpush.msra.mxu0 %v43_v6  ;;  %v48_v20 = vld [vmem:[#allocation5 + $0x28] sm:$0xff]  ;;  %v47_v21 = vld [vmem:[#allocation5 + $0x20] sm:$0xff] }
  0x13   :  { %156 = vmatmul.msk.f32.vlgmr.msra.gmra.mxu0 %vm65_vm0, %v42_v7  ;;  %97 = vmatpush.msra.mxu1 %v60_v8  ;;  %v64_v22 = vperm.slane %v47_v21, 0  ;;  %v93_v29 = vperm.slane %v47_v21, 1 }
  0x15   :  { %98 = vmatpush.msra.mxu1 %v59_v9 }
  0x17   :  { %99 = vmatpush.msra.mxu1 %v58_v10 }
  0x19   :  { %100 = vmatpush.msra.mxu1 %v57_v11 }
  0x1b   :  { %101 = vmatpush.msra.mxu1 %v56_v12 }
  0x1d   :  { %102 = vmatpush.msra.mxu1 %v55_v13 }
  0x1f   :  { %103 = vmatpush.msra.mxu1 %v54_v14 }
  0x21   :  { %104 = vmatpush.msra.mxu1 %v53_v15 }
  0x23   :  { %105 = vmatpush.msra.mxu1 %v52_v16 }
  0x25   :  { %106 = vmatpush.msra.mxu1 %v51_v17 }
  0x27   :  { %107 = vmatpush.msra.mxu1 %v50_v18 }
  0x29   :  { %108 = vmatpush.msra.mxu1 %v49_v19 }
  0x2b   :  { %109 = vmatpush.msra.mxu1 %v48_v20 }
  0x90   :  { %v86_v23 = vpop.f32.mrf.mxu0 }
  0x91   :  { %v87_v24 = vadd.f32 %v86_v23, %v64_v22 }
  0x93   :  { %v89_v25 = vmul.f32 0.5, %v87_v24 }
  0x95   :  { %162 = vtanh.f32 %v89_v25 }
  0x9b   :  { %v163_v26 = vpop.eup %162 }
  0x9c   :  { %v91_v27 = vadd.f32 1.0, %v163_v26 }
  0x9e   :  { %v92_v28 = vmul.f32 0.5, %v91_v27 }
  0xa0   :  { %110 = vmatmul.f32.vlgmr.msra.gmra.mxu1 %v92_v28 }
 0x11d   :  { %v111_v30 = vpop.f32.mrf.mxu1 }
 0x11e   :  { %v112_v31 = vadd.f32 %v111_v30, %v93_v29 }
 0x120   :  { %v114_v32 = vmul.f32 1.442695, %v112_v31 }
 0x122   :  { %164 = vpow2.f32 %v114_v32 }
 0x128   :  { %v165_v33 = vpop.eup %164 }
 0x129   :  { %v116_v34 = vrot.slane %v165_v33, 4 }
 0x12b   :  { %v117_v35 = vadd.f32 %v165_v33, %v116_v34 }
 0x12d   :  { %v118_v36 = vrot.slane %v117_v35, 2 }
 0x12f   :  { %v119_v37 = vadd.f32 %v118_v36, %v117_v35 }
 0x131   :  { %v120_v38 = vrot.slane %v119_v37, 1 }
 0x133   :  { %v121_v39 = vadd.f32 %v120_v38, %v119_v37 }
 0x135   :  { %166 = vrcp.f32 %v121_v39  ;;  %v133_v43 = vand.u32 2147483648, %v121_v39  ;;  %v131_v45 = vand.u32 2147483647, %v121_v39  ;;  %vm127_vm2 = vweird.f32 %v121_v39 }
 0x137   :  { %v134_v47 = vor.u32 1.1754944e-38, %v133_v43  ;;  %vm132_vm4 = vcmp.eq.f32.partialorder %v131_v45, 8.507059e+37 }
 0x13b   :  { %v167_v40 = vpop.eup %166 }
 0x13c   :  { %v123_v41 = vmul.f32 %v167_v40, %v121_v39  ;;  %vm128_vm1 = vweird.f32 %v167_v40 }
 0x13d   :  { %vm129_vm3 = vmor %vm127_vm2, %vm128_vm1 }
 0x13e   :  { %v124_v42 = vsub.f32 1.0, %v123_v41 }
 0x140   :  { %v125_v44 = vmul.f32 %v167_v40, %v124_v42 }
 0x142   :  { %v126_v46 = vadd.f32 %v167_v40, %v125_v44 }
 0x144   :  { %v130_v48 = vsel %vm129_vm3, %v167_v40, %v126_v46 }
 0x145   :  { %v135_v49 = vsel %vm132_vm4, %v134_v47, %v130_v48 }
 0x146   :  { %v136_v50 = vmul.f32 %v165_v33, %v135_v49 }
 0x148   :  { %137 = vst [vmem:[#allocation7] sm:$0xff] %v136_v50 }
 0x149   :  { %148 = dma.vmem_to_hbm [thread:$0]  %s144_s1, 128, %s146_s23, [#allocation4]  }
 0x14a   :  { %244 = dma.done.wait [#allocation4], 128  }
 0x14b   :  { %245 = vsyncadd [#allocation4], 4294967168 }
 0x14c   :  { %153 = vsyncpa [#allocation3], 1 }
 0x14d   :  { %154 = vsyncpa [#allocation6], 1 }
 0x14e   :  { %155 = vsyncpa [#allocation4], 1 }

</bundles_post_ra>
